<compile_context>
chip_gen: v5e
topology: v5e:2x2
jax: 0.10.0
libtpu: 0.0.40
codegen_flags: <defaults>
</compile_context>

<pallas_src>
import functools

import jax
import jax.numpy as jnp
from jax import lax
from jax.experimental import pallas as pl
from jax.experimental.pallas import tpu as pltpu


def _round_up(x, m):
    return (x + m - 1) // m * m


def _cdiv(a, b):
    return (a + b - 1) // b


def _tpu_config():
    """Best-effort query: (physical VMEM bytes per core, #TensorCores/chip)."""
    vmem_cap = 64 * 1024 * 1024   # conservative default = v7x per-TC VMEM
    num_tc = 1
    try:
        info = pltpu.get_tpu_info()
        vmem_cap = int(getattr(info, "vmem_capacity_bytes", vmem_cap))
        for attr in ("num_tensorcores", "tensorcores_per_chip", "num_cores"):
            v = getattr(info, attr, None)
            if v:
                num_tc = int(v)
                break
    except Exception:
        pass
    if num_tc <= 1:
        try:
            if "v7" in jax.devices()[0].device_kind.lower():
                num_tc = 2
        except Exception:
            pass
    return vmem_cap, num_tc


def _kl_sum_kernel(ps_ref, pe_ref, ts_ref, te_ref, out_ref, *,
                   tiles_per_slice, rows_per_tile, n_rows, mask_tail):
    """One grid step over a (rows_per_tile, L) row tile.

    Grid is (num_slices, tiles_per_slice).  The (rows_per_tile, 1) output
    block is resident across the inner 'arbitrary' axis and accumulates the
    per-row KL sums (lane reduce on the XLU, VPU add); no wide partials are
    ever written to HBM.
    """
    i = pl.program_id(1)

    @pl.when(i == 0)
    def _():
        out_ref[...] = jnp.zeros_like(out_ref)

    def kl_row_sums(pred_ref, tgt_ref):
        x = pred_ref[...].astype(jnp.float32)   # (TN, L)
        t = tgt_ref[...].astype(jnp.float32)    # (TN, L)
        # Numerically stable log_softmax over the bin axis.
        m = jnp.max(x, axis=-1, keepdims=True)
        lse = jnp.log(jnp.sum(jnp.exp(x - m), axis=-1, keepdims=True)) + m
        logp = x - lse
        # KLDivLoss(reduction='none'): t * (log t - logp), zero where t <= 0.
        log_t = jnp.log(jnp.maximum(t, jnp.finfo(jnp.float32).tiny))
        kl = jnp.where(t > 0, t * (log_t - logp), 0.0)
        return jnp.sum(kl, axis=-1, keepdims=True)          # (TN, 1)

    contrib = kl_row_sums(ps_ref, ts_ref) + kl_row_sums(pe_ref, te_ref)

    if mask_tail:
        # Explicit row-index mask for the ragged tail: out-of-range VMEM may
        # hold garbage (possibly > 0 or NaN), so do NOT rely on the t>0 mask.
        tile_idx = pl.program_id(0) * tiles_per_slice + i
        row0 = tile_idx * rows_per_tile
        row_ids = row0 + lax.broadcasted_iota(
            jnp.int32, (rows_per_tile, 1), 0)
        contrib = jnp.where(row_ids < n_rows, contrib, 0.0)

    out_ref[...] += contrib


def kl_discret_loss(output_s, output_e, target_s, target_e, *,
                    rows_per_tile=None, input_buffering=None):
    """Pallas implementation of KLDiscretLoss.forward. Inputs: (B, J, L)."""
    B, J, L = output_s.shape
    n_rows = B * J

    ps = output_s.reshape(n_rows, L)
    pe = output_e.reshape(n_rows, L)
    ts = target_s.reshape(n_rows, L)
    te = target_e.reshape(n_rows, L)

    # ---- generation-aware VMEM budget & tile sizing -----------------------
    vmem_cap, num_tc = _tpu_config()
    vmem_limit_cap = min(vmem_cap * 3 // 4, 96 * 1024 * 1024)
    tile_budget = max(vmem_limit_cap * 2 // 3, 4 * 1024 * 1024)

    in_itemsize = max(jnp.dtype(a.dtype).itemsize for a in (ps, pe, ts, te))
    lanes = _round_up(L, 128)   # VMEM lane padding
    # 4 double-buffered input streams + ~6 f32 elementwise temporaries that
    # Mosaic materializes for the two-pass log-softmax / KL, per tile row.
    bytes_per_row = 4 * 2 * lanes * in_itemsize + 6 * lanes * 4

    vmem_cap_rows = max(8, (tile_budget // bytes_per_row) // 8 * 8)
    if rows_per_tile is None:
        rows_per_tile = 1024 if vmem_cap <= 64 * 1024 * 1024 else 2048
    rows_per_tile = max(8, min(rows_per_tile, vmem_cap_rows,
                               _round_up(n_rows, 8)))
    rows_per_tile = _round_up(rows_per_tile, 8)
    if n_rows < rows_per_tile:
        # Single block equal to the full row extent (always a legal block).
        rows_per_tile = n_rows

    total_tiles = _cdiv(n_rows, rows_per_tile)
    # Split across TensorCores only when the chip actually has >1 TC (v7x).
    num_slices = 2 if (num_tc >= 2 and total_tiles >= 2) else 1
    tiles_per_slice = _cdiv(total_tiles, num_slices)
    covered_rows = num_slices * tiles_per_slice * rows_per_tile
    mask_tail = covered_rows != n_rows

    footprint = rows_per_tile * bytes_per_row + 2 * rows_per_tile * 4
    vmem_limit_bytes = int(min(vmem_limit_cap,
                               max(footprint + 8 * 1024 * 1024,
                                   16 * 1024 * 1024)))

    # ---- specs ------------------------------------------------------------
    last_tile = total_tiles - 1
    if num_slices * tiles_per_slice > total_tiles:
        # A fully out-of-range tile can exist when the slices over-cover;
        # clamp its block index (its contribution is zeroed by the row mask).
        def in_index_map(p, i):
            return (jnp.minimum(p * tiles_per_slice + i, last_tile), 0)
    else:
        def in_index_map(p, i):
            return (p * tiles_per_slice + i, 0)

    spec_kwargs = {}
    if input_buffering is not None and input_buffering != 2:
        spec_kwargs["pipeline_mode"] = pl.Buffered(input_buffering)
    in_spec = pl.BlockSpec((rows_per_tile, L), in_index_map, **spec_kwargs)

    kernel = functools.partial(
        _kl_sum_kernel,
        tiles_per_slice=tiles_per_slice,
        rows_per_tile=rows_per_tile,
        n_rows=n_rows,
        mask_tail=mask_tail,
    )

    partials = pl.pallas_call(
        kernel,
        out_shape=jax.ShapeDtypeStruct((num_slices * rows_per_tile, 1),
                                       jnp.float32),
        grid_spec=pltpu.PrefetchScalarGridSpec(
            num_scalar_prefetch=0,
            grid=(num_slices, tiles_per_slice),
            in_specs=[in_spec, in_spec, in_spec, in_spec],
            out_specs=pl.BlockSpec((rows_per_tile, 1), lambda p, i: (p, 0)),
        ),
        compiler_params=pltpu.CompilerParams(
            dimension_semantics=("parallel", "arbitrary"),
            vmem_limit_bytes=vmem_limit_bytes,
        ),
    )(ps, pe, ts, te)

    # Tiny final reduce of the per-row partial sums, then the scalar
    # normalization that reproduces the per-joint mean-of-means.
    return jnp.sum(partials) / (B * J * L)


def _reference_loss(output_s, output_e, target_s, target_e):
    """Pure-JAX port of the PyTorch module, for verification."""
    J = output_s.shape[1]

    def criterion(pred, tgt):  # pred, tgt: (B, L)
        logp = jax.nn.log_softmax(pred, axis=1)
        safe_t = jnp.where(tgt > 0, tgt, 1.0)
        kl = jnp.where(tgt > 0, tgt * (jnp.log(safe_t) - logp), 0.0)
        return jnp.mean(kl, axis=1)

    loss = 0.0
    for j in range(J):
        loss += criterion(output_s[:, j], target_s[:, j]).mean()
        loss += criterion(output_e[:, j], target_e[:, j]).mean()
    return loss / J


if __name__ == "__main__":
    key = jax.random.PRNGKey(0)
    B, J, L = 2, 4, 32  # batch, num_joints, discrete bins

    k1, k2, k3, k4 = jax.random.split(key, 4)
    output_s = jax.random.normal(k1, (B, J, L), dtype=jnp.float32)
    output_e = jax.random.normal(k2, (B, J, L), dtype=jnp.float32)
    # Targets are (soft) probability distributions over the L bins.
    target_s = jax.nn.softmax(
        jax.random.normal(k3, (B, J, L), dtype=jnp.float32), axis=-1)
    target_e = jax.nn.softmax(
        jax.random.normal(k4, (B, J, L), dtype=jnp.float32), axis=-1)

    loss = kl_discret_loss(output_s, output_e, target_s, target_e)
    loss = jax.block_until_ready(loss)

    ref = _reference_loss(output_s, output_e, target_s, target_e)
    assert jnp.allclose(loss, ref, rtol=1e-5, atol=1e-6), (loss, ref)

    print("KERNEL_OK")
</pallas_src>

<mosaic_0001>
module attributes {stable_mosaic.version = 11 : i64} {
  func.func @_kl_sum_kernel(%arg0: i32, %arg1: i32, %arg2: memref<8x32xf32, #tpu.memory_space<vmem>>, %arg3: memref<8x32xf32, #tpu.memory_space<vmem>>, %arg4: memref<8x32xf32, #tpu.memory_space<vmem>>, %arg5: memref<8x32xf32, #tpu.memory_space<vmem>>, %arg6: memref<8x1xf32, #tpu.memory_space<vmem>>) attributes {dimension_semantics = [#tpu.dimension_semantics<parallel>, #tpu.dimension_semantics<arbitrary>], iteration_bounds = array<i64: 1, 1>, scalar_prefetch = 0 : i64, scratch_operands = 0 : i64, tpu.core_type = #tpu.core_type<tc>, window_params = [{transform_indices = @transform_0, window_bounds = array<i64: 8, 32>}, {transform_indices = @transform_1, window_bounds = array<i64: 8, 32>}, {transform_indices = @transform_2, window_bounds = array<i64: 8, 32>}, {transform_indices = @transform_3, window_bounds = array<i64: 8, 32>}, {transform_indices = @transform_4, window_bounds = array<i64: 8, 1>}]} {
    %c0_i32 = arith.constant 0 : i32
    %0 = arith.cmpi eq, %arg1, %c0_i32 : i32
    %1 = arith.extui %0 : i1 to i32
    %c0_i32_0 = arith.constant 0 : i32
    %2 = arith.cmpi ne, %1, %c0_i32_0 : i32
    scf.if %2 {
      %cst_23 = arith.constant 0.000000e+00 : f32
      %55 = vector.broadcast %cst_23 : f32 to vector<8x1xf32>
      %c0_24 = arith.constant 0 : index
      %c0_25 = arith.constant 0 : index
      %56 = vector.load %arg6[%c0_24, %c0_25] : memref<8x1xf32, #tpu.memory_space<vmem>>, vector<8x1xf32>
      tpu.vector_store %arg6[%c0_24, %c0_25], %55 {strides = array<i32>} : memref<8x1xf32, #tpu.memory_space<vmem>>, vector<8x1xf32>,
    } else {
    }
    %c0 = arith.constant 0 : index
    %c0_1 = arith.constant 0 : index
    %3 = vector.load %arg2[%c0, %c0_1] : memref<8x32xf32, #tpu.memory_space<vmem>>, vector<8x32xf32>
    %c0_2 = arith.constant 0 : index
    %c0_3 = arith.constant 0 : index
    %4 = vector.load %arg4[%c0_2, %c0_3] : memref<8x32xf32, #tpu.memory_space<vmem>>, vector<8x32xf32>
    %cst = arith.constant dense<0xFF800000> : vector<8xf32>
    %5 = vector.multi_reduction <maximumf>, %3, %cst [1] : vector<8x32xf32> to vector<8xf32>
    %6 = vector.shape_cast %5 : vector<8xf32> to vector<8x1xf32>
    %7 = vector.broadcast %6 : vector<8x1xf32> to vector<8x32xf32>
    %8 = arith.subf %3, %7 : vector<8x32xf32>
    %9 = math.exp %8 : vector<8x32xf32>
    %cst_4 = arith.constant dense<0.000000e+00> : vector<8xf32>
    %10 = vector.multi_reduction <add>, %9, %cst_4 [1] : vector<8x32xf32> to vector<8xf32>
    %11 = vector.shape_cast %10 : vector<8xf32> to vector<8x1xf32>
    %12 = math.log %11 : vector<8x1xf32>
    %13 = arith.addf %12, %6 : vector<8x1xf32>
    %14 = vector.broadcast %13 : vector<8x1xf32> to vector<8x32xf32>
    %15 = arith.subf %3, %14 : vector<8x32xf32>
    %cst_5 = arith.constant 1.17549435E-38 : f32
    %16 = vector.broadcast %cst_5 : f32 to vector<8x32xf32>
    %17 = arith.maximumf %4, %16 : vector<8x32xf32>
    %18 = math.log %17 : vector<8x32xf32>
    %cst_6 = arith.constant 0.000000e+00 : f32
    %19 = vector.broadcast %cst_6 : f32 to vector<8x32xf32>
    %20 = arith.cmpf ogt, %4, %19 : vector<8x32xf32>
    %21 = arith.subf %18, %15 : vector<8x32xf32>
    %22 = arith.mulf %4, %21 : vector<8x32xf32>
    %cst_7 = arith.constant 0.000000e+00 : f32
    %23 = vector.broadcast %cst_7 : f32 to vector<8x32xf32>
    %24 = arith.select %20, %22, %23 : vector<8x32xi1>, vector<8x32xf32>
    %cst_8 = arith.constant dense<0.000000e+00> : vector<8xf32>
    %25 = vector.multi_reduction <add>, %24, %cst_8 [1] : vector<8x32xf32> to vector<8xf32>
    %26 = vector.shape_cast %25 : vector<8xf32> to vector<8x1xf32>
    %c0_9 = arith.constant 0 : index
    %c0_10 = arith.constant 0 : index
    %27 = vector.load %arg3[%c0_9, %c0_10] : memref<8x32xf32, #tpu.memory_space<vmem>>, vector<8x32xf32>
    %c0_11 = arith.constant 0 : index
    %c0_12 = arith.constant 0 : index
    %28 = vector.load %arg5[%c0_11, %c0_12] : memref<8x32xf32, #tpu.memory_space<vmem>>, vector<8x32xf32>
    %cst_13 = arith.constant dense<0xFF800000> : vector<8xf32>
    %29 = vector.multi_reduction <maximumf>, %27, %cst_13 [1] : vector<8x32xf32> to vector<8xf32>
    %30 = vector.shape_cast %29 : vector<8xf32> to vector<8x1xf32>
    %31 = vector.broadcast %30 : vector<8x1xf32> to vector<8x32xf32>
    %32 = arith.subf %27, %31 : vector<8x32xf32>
    %33 = math.exp %32 : vector<8x32xf32>
    %cst_14 = arith.constant dense<0.000000e+00> : vector<8xf32>
    %34 = vector.multi_reduction <add>, %33, %cst_14 [1] : vector<8x32xf32> to vector<8xf32>
    %35 = vector.shape_cast %34 : vector<8xf32> to vector<8x1xf32>
    %36 = math.log %35 : vector<8x1xf32>
    %37 = arith.addf %36, %30 : vector<8x1xf32>
    %38 = vector.broadcast %37 : vector<8x1xf32> to vector<8x32xf32>
    %39 = arith.subf %27, %38 : vector<8x32xf32>
    %cst_15 = arith.constant 1.17549435E-38 : f32
    %40 = vector.broadcast %cst_15 : f32 to vector<8x32xf32>
    %41 = arith.maximumf %28, %40 : vector<8x32xf32>
    %42 = math.log %41 : vector<8x32xf32>
    %cst_16 = arith.constant 0.000000e+00 : f32
    %43 = vector.broadcast %cst_16 : f32 to vector<8x32xf32>
    %44 = arith.cmpf ogt, %28, %43 : vector<8x32xf32>
    %45 = arith.subf %42, %39 : vector<8x32xf32>
    %46 = arith.mulf %28, %45 : vector<8x32xf32>
    %cst_17 = arith.constant 0.000000e+00 : f32
    %47 = vector.broadcast %cst_17 : f32 to vector<8x32xf32>
    %48 = arith.select %44, %46, %47 : vector<8x32xi1>, vector<8x32xf32>
    %cst_18 = arith.constant dense<0.000000e+00> : vector<8xf32>
    %49 = vector.multi_reduction <add>, %48, %cst_18 [1] : vector<8x32xf32> to vector<8xf32>
    %50 = vector.shape_cast %49 : vector<8xf32> to vector<8x1xf32>
    %51 = arith.addf %26, %50 : vector<8x1xf32>
    %c0_19 = arith.constant 0 : index
    %c0_20 = arith.constant 0 : index
    %52 = vector.load %arg6[%c0_19, %c0_20] : memref<8x1xf32, #tpu.memory_space<vmem>>, vector<8x1xf32>
    %53 = arith.addf %52, %51 : vector<8x1xf32>
    %c0_21 = arith.constant 0 : index
    %c0_22 = arith.constant 0 : index
    %54 = vector.load %arg6[%c0_21, %c0_22] : memref<8x1xf32, #tpu.memory_space<vmem>>, vector<8x1xf32>
    tpu.vector_store %arg6[%c0_21, %c0_22], %53 {strides = array<i32>} : memref<8x1xf32, #tpu.memory_space<vmem>>, vector<8x1xf32>,
    return
  }
  func.func @transform_0(%arg0: i32, %arg1: i32) -> (i32, i32) {
    %c1_i32 = arith.constant 1 : i32
    %0 = arith.muli %arg0, %c1_i32 : i32
    %1 = arith.addi %0, %arg1 : i32
    %c0_i32 = arith.constant 0 : i32
    %c0_i32_0 = arith.constant 0 : i32
    return %1, %c0_i32 : i32, i32
  }
  func.func @transform_1(%arg0: i32, %arg1: i32) -> (i32, i32) {
    %c1_i32 = arith.constant 1 : i32
    %0 = arith.muli %arg0, %c1_i32 : i32
    %1 = arith.addi %0, %arg1 : i32
    %c0_i32 = arith.constant 0 : i32
    %c0_i32_0 = arith.constant 0 : i32
    return %1, %c0_i32 : i32, i32
  }
  func.func @transform_2(%arg0: i32, %arg1: i32) -> (i32, i32) {
    %c1_i32 = arith.constant 1 : i32
    %0 = arith.muli %arg0, %c1_i32 : i32
    %1 = arith.addi %0, %arg1 : i32
    %c0_i32 = arith.constant 0 : i32
    %c0_i32_0 = arith.constant 0 : i32
    return %1, %c0_i32 : i32, i32
  }
  func.func @transform_3(%arg0: i32, %arg1: i32) -> (i32, i32) {
    %c1_i32 = arith.constant 1 : i32
    %0 = arith.muli %arg0, %c1_i32 : i32
    %1 = arith.addi %0, %arg1 : i32
    %c0_i32 = arith.constant 0 : i32
    %c0_i32_0 = arith.constant 0 : i32
    return %1, %c0_i32 : i32, i32
  }
  func.func @transform_4(%arg0: i32, %arg1: i32) -> (i32, i32) {
    %c0_i32 = arith.constant 0 : i32
    %c0_i32_0 = arith.constant 0 : i32
    return %arg0, %c0_i32 : i32, i32
  }
}

</mosaic_0001>

<bundles_post_ra>
// kernel: tpu_custom_call.1
= control target key start
LH: loop header
LB: loop body
LE: loop exit
PB: predicated region body
PF: predicated region fallthrough
CT: control target
= control target key end

     0   :  { %9 = vsyncpa [#allocation3], 0  ;;  %s335_s0 = inlined_call_operand.hbm [shape: f32[8,32], index: 0, kind: input, shape index: {}]   ;;  %s336_s1 = inlined_call_operand.hbm [shape: f32[8,32], index: 1, kind: input, shape index: {}]   ;;  %s337_s2 = inlined_call_operand.hbm [shape: f32[8,32], index: 2, kind: input, shape index: {}]   ;;  %s338_s3 = inlined_call_operand.hbm [shape: f32[8,32], index: 3, kind: input, shape index: {}]   ;;  %s339_s4 = inlined_call_operand.vmem [shape: f32[8,1], index: 4, kind: output, shape index: {}]  }
   0x1   :  { %10 = vsyncpa [#allocation5], 0  ;;  %s34_s17 = sshll.u32 %s336_s1, 4  ;;  %s35_s17 = int_to_ptr.hbm [resolvable:$true] %s34_s17 }
   0x2   :  { %11 = vsyncpa [#allocation8], 0  ;;  %s276_s18 = smov [#allocation4]   ;;  %s20_s22 = sshll.u32 %s335_s0, 4  ;;  %s21_s22 = int_to_ptr.hbm [resolvable:$true] %s20_s22 }
   0x3   :  { %s36_s19 = sshll.u32 %s276_s18, 4  ;;  %s277_s23 = smov [#allocation2]   ;;  %s37_s19 = int_to_ptr.vmem [resolvable:$true] %s36_s19 }
   0x4   :  { %39 = dma.hbm_to_vmem [thread:$0]  %s35_s17, 128, %s37_s19, [#allocation5]  }
   0x5   :  { %s22_s24 = sshll.u32 %s277_s23, 4  ;;  %s48_s27 = sshll.u32 %s337_s2, 4  ;;  %s23_s24 = int_to_ptr.vmem [resolvable:$true] %s22_s24  ;;  %s49_s27 = int_to_ptr.hbm [resolvable:$true] %s48_s27 }
   0x6   :  { %25 = dma.hbm_to_vmem [thread:$0]  %s21_s22, 128, %s23_s24, [#allocation3]  }
   0x7   :  { %s62_s29 = sshll.u32 %s338_s3, 4  ;;  %s278_s30 = smov [#allocation6]   ;;  %s63_s29 = int_to_ptr.hbm [resolvable:$true] %s62_s29 }
   0x8   :  { %s50_s5 = sshll.u32 %s278_s30, 4  ;;  %s279_s0 = smov [#allocation7]   ;;  %s51_s5 = int_to_ptr.vmem [resolvable:$true] %s50_s5 }
   0x9   :  { %53 = dma.hbm_to_vmem [thread:$0]  %s49_s27, 128, %s51_s5, [#allocation5]  }
   0xa   :  { %s64_s6 = sshll.u32 %s279_s0, 4  ;;  %s65_s6 = int_to_ptr.vmem [resolvable:$true] %s64_s6 }
   0xb   :  { %67 = dma.hbm_to_vmem [thread:$0]  %s63_s29, 128, %s65_s6, [#allocation8]  }
   0xc   :  { %270 = dma.done.wait [#allocation3], 128  }
   0xd   :  { %271 = vsyncadd [#allocation3], 4294967168 }
   0xe   :  { %272 = dma.done.wait [#allocation5], 256  }
   0xf   :  { %273 = vsyncadd [#allocation5], 4294967040 }
  0x10   :  { %274 = dma.done.wait [#allocation8], 128  }
  0x11   :  { %275 = vsyncadd [#allocation8], 4294967168  ;;  %vm92_vm0 = vcmask 7168   ;;  %v280_v0 = vmov 0.0   ;;  %vm96_vm1 = vcmask 261120   ;;  %v94_v1 = vld [vmem:[#allocation2] sm:$0xff] }
  0x12   :  { %93 = vst.msk [vmem:[%s339_s4] sm:$0xff] %vm92_vm0, %v280_v0  ;;  %v97_v2 = vsel %vm96_vm1, %v94_v1, -inf  ;;  %v120_v3 = vld [vmem:[#allocation4] sm:$0xff]  ;;  %v95_v15 = vld [vmem:[#allocation6] sm:$0xff]  ;;  %v121_v18 = vld [vmem:[#allocation7] sm:$0xff] }
  0x13   :  { %98 = vmax.xlane.f32.xlu0 %v97_v2  ;;  %v122_v4 = vsel %vm96_vm1, %v120_v3, -inf  ;;  %v110_v16 = vmax.f32 %v95_v15, 1.1754944e-38  ;;  %v135_v19 = vmax.f32 %v121_v18, 1.1754944e-38  ;;  %vm113_vm2 = vcmp.gt.f32.partialorder %v95_v15, 0.0 }
  0x14   :  { %vm138_vm3 = vcmp.gt.f32.partialorder %v121_v18, 0.0 }
  0x19   :  { %v146_v43 = vld [vmem:[%s339_s4] sm:$0xff] }
  0x1b   :  { %123 = vmax.xlane.f32.xlu0 %v122_v4 }
  0x86   :  { %v99_v5 = vpop.xlane.xlu0 %98 }
  0x87   :  { %v100_v6 = vsub.f32 %v94_v1, %v99_v5 }
  0x89   :  { %v101_v7 = vmul.f32 1.442695, %v100_v6 }
  0x8b   :  { %162 = vpow2.f32 %v101_v7 }
  0x8e   :  { %v124_v8 = vpop.xlane.xlu0 %123 }
  0x8f   :  { %v125_v9 = vsub.f32 %v120_v3, %v124_v8 }
  0x91   :  { %v163_v10 = vpop.eup %162  ;;  %v126_v11 = vmul.f32 1.442695, %v125_v9 }
  0x92   :  { %v103_v12 = vsel %vm96_vm1, %v163_v10, 0.0 }
  0x93   :  { %164 = vpow2.f32 %v126_v11  ;;  %104 = vadd.xlane.f32.xlu1 %v103_v12 }
  0x94   :  { %166 = vlog2.f32 %v110_v16 }
  0x99   :  { %v165_v13 = vpop.eup %164 }
  0x9a   :  { %v128_v14 = vsel %vm96_vm1, %v165_v13, 0.0  ;;  %v167_v20 = vpop.eup %166 }
  0x9b   :  { %129 = vadd.xlane.f32.xlu1 %v128_v14  ;;  %v112_v25 = vmul.f32 0.6931472, %v167_v20 }
 0x106   :  { %v105_v17 = vpop.xlane.xlu1 %104 }
 0x107   :  { %168 = vlog2.f32 %v105_v17 }
 0x108   :  { %170 = vlog2.f32 %v135_v19 }
 0x10d   :  { %v169_v21 = vpop.eup %168 }
 0x10e   :  { %v107_v22 = vmul.f32 0.6931472, %v169_v21  ;;  %v130_v23 = vpop.xlane.xlu1 %129  ;;  %v171_v27 = vpop.eup %170 }
 0x10f   :  { %172 = vlog2.f32 %v130_v23  ;;  %v137_v34 = vmul.f32 0.6931472, %v171_v27 }
 0x110   :  { %v108_v24 = vadd.f32 %v107_v22, %v99_v5 }
 0x112   :  { %v109_v26 = vsub.f32 %v94_v1, %v108_v24 }
 0x114   :  { %v114_v28 = vsub.f32 %v112_v25, %v109_v26 }
 0x115   :  { %v173_v29 = vpop.eup %172 }
 0x116   :  { %v132_v30 = vmul.f32 0.6931472, %v173_v29  ;;  %v115_v31 = vmul.f32 %v114_v28, %v95_v15 }
 0x118   :  { %v133_v32 = vadd.f32 %v132_v30, %v124_v8  ;;  %v116_v33 = vsel %vm113_vm2, %v115_v31, 0.0 }
 0x119   :  { %v117_v35 = vsel %vm96_vm1, %v116_v33, 0.0 }
 0x11a   :  { %v134_v36 = vsub.f32 %v120_v3, %v133_v32  ;;  %118 = vadd.xlane.f32.xlu2 %v117_v35 }
 0x11c   :  { %v139_v37 = vsub.f32 %v137_v34, %v134_v36 }
 0x11e   :  { %v140_v38 = vmul.f32 %v139_v37, %v121_v18 }
 0x120   :  { %v141_v39 = vsel %vm138_vm3, %v140_v38, 0.0 }
 0x121   :  { %v142_v40 = vsel %vm96_vm1, %v141_v39, 0.0 }
 0x122   :  { %143 = vadd.xlane.f32.xlu2 %v142_v40 }
 0x18d   :  { %v119_v41 = vpop.xlane.xlu2 %118 }
 0x195   :  { %v144_v42 = vpop.xlane.xlu2 %143 }
 0x196   :  { %v145_v44 = vadd.f32 %v144_v42, %v119_v41 }
 0x198   :  { %v147_v45 = vadd.f32 %v146_v43, %v145_v44 }
 0x19a   :  { %149 = vst.msk [vmem:[%s339_s4] sm:$0xff] %vm92_vm0, %v147_v45 }
 0x19b   :  { %154 = vsyncpa [#allocation3], 1 }
 0x19c   :  { %155 = vsyncpa [#allocation5], 1 }
 0x19d   :  { %156 = vsyncpa [#allocation8], 1 }

</bundles_post_ra>
